<compile_context>
chip_gen: v7x
topology: tpu7x:2x2x1
jax: 0.10.0
libtpu: 0.0.40
codegen_flags: <defaults>
</compile_context>

<pallas_src>
import jax
import jax.numpy as jnp
from jax.experimental import pallas as pl
from jax.experimental.pallas import tpu as pltpu


def _round_up(x, m):
    return ((x + m - 1) // m) * m


def cp_regression_kernel(z_ref, kr_ref, dT_ref, o_ref, t_acc):
    """out = (z @ KR) @ D^T with the IJK contraction tiled on grid axis 1."""
    k = pl.program_id(1)

    @pl.when(k == 0)
    def _():
        t_acc[...] = jnp.zeros_like(t_acc)

    # Stage 1: t[b, r] += sum_{ijk in tile} z[b, ijk] * KR[ijk, r]
    # bf16 operands, f32 accumulation.
    t_acc[...] += jnp.dot(z_ref[...], kr_ref[...],
                          preferred_element_type=jnp.float32)

    # Stage 2 (last reduction step only): out[b, o] = sum_r t[b, r] * D[o, r]
    @pl.when(k == pl.num_programs(1) - 1)
    def _():
        o_ref[...] = jnp.dot(t_acc[...].astype(jnp.bfloat16), dT_ref[...],
                             preferred_element_type=jnp.float32
                             ).astype(o_ref.dtype)


def build_cp_operands(A, B, C, D):
    """Hoisted preprocessing: fused Khatri-Rao matrix and transposed output factor.

    Depends only on the CP factors, so at inference it is computed once and
    reused across forward calls (saves an XLA fusion + HBM round trip per call).
    """
    I, R = A.shape
    J, K = B.shape[0], C.shape[0]
    # Row (i*J*K + j*K + k) = A[i] * B[j] * C[k]  — matches row-major flatten of z.
    KR = (A[:, None, None, :] * B[None, :, None, :] * C[None, None, :, :]
          ).reshape(I * J * K, R)
    # bf16 streams halve HBM bytes; accumulation stays f32 inside the kernel.
    return KR.astype(jnp.bfloat16), D.T.astype(jnp.bfloat16)


def _pick_tiles(Bsz, IJK, R, O):
    # IJK tile: full extent when small, else lane-aligned 2048 chunks.
    tk = IJK if IJK <= 2048 else 2048
    ijk_pad = _round_up(IJK, tk)

    # Batch tile: >=2 grid steps once Bsz >= 16 so the "parallel" axis can shard
    # across v7x's two TensorCores (neutral on single-TC v5e/v6e); otherwise one
    # full-batch step.  Capped at 1024 rows and by the VMEM budget below.
    if Bsz < 16:
        bt = Bsz
    else:
        bt = min(1024, _round_up(pl.cdiv(Bsz, 2), 8))

    def vmem_bytes(bt_):
        z_tile = bt_ * tk * 2       # bf16 input tile
        o_tile = bt_ * O * 4        # f32 output tile
        kr_tile = tk * R * 2        # bf16 KR tile
        dT_tile = R * O * 2         # bf16 D^T (resident)
        acc = bt_ * R * 4           # f32 scratch accumulator
        return 2 * (z_tile + o_tile + kr_tile + dT_tile) + acc  # double-buffered

    budget = 24 << 20               # comfortably under v7x's 64 MiB physical VMEM
    while bt > 8 and vmem_bytes(bt) > budget:
        bt = max(8, bt // 2)
    return bt, tk, ijk_pad


def cp_regression(z, KR, D_T):
    """out[b, o] = sum_{ijk, r} z[b, ijk] * KR[ijk, r] * D_T[r, o]."""
    Bsz = z.shape[0]
    IJK, R = KR.shape
    O = D_T.shape[1]

    z_flat = z.reshape(Bsz, IJK).astype(jnp.bfloat16)

    bt, tk, ijk_pad = _pick_tiles(Bsz, IJK, R, O)
    if ijk_pad != IJK:
        # Zero padding keeps the contraction exact; only hit for very large IJK.
        z_flat = jnp.pad(z_flat, ((0, 0), (0, ijk_pad - IJK)))
        KR = jnp.pad(KR, ((0, ijk_pad - IJK), (0, 0)))

    grid = (pl.cdiv(Bsz, bt), ijk_pad // tk)

    cost = pl.CostEstimate(
        flops=2 * Bsz * (IJK * R + R * O),
        bytes_accessed=(z_flat.size * 2 + KR.size * 2 + D_T.size * 2
                        + Bsz * O * 4),
        transcendentals=0,
    )

    return pl.pallas_call(
        cp_regression_kernel,
        out_shape=jax.ShapeDtypeStruct((Bsz, O), jnp.float32),
        grid=grid,
        in_specs=[
            pl.BlockSpec((bt, tk), lambda b, k: (b, k)),   # z tile (batch x IJK-chunk)
            pl.BlockSpec((tk, R), lambda b, k: (k, 0)),    # fused Khatri-Rao tile
            pl.BlockSpec((R, O), lambda b, k: (0, 0)),     # D^T (resident, lane-dense O)
        ],
        out_specs=pl.BlockSpec((bt, O), lambda b, k: (b, 0)),
        scratch_shapes=[pltpu.VMEM((bt, R), jnp.float32)],
        compiler_params=pltpu.CompilerParams(
            dimension_semantics=("parallel", "arbitrary"),
            vmem_limit_bytes=48 << 20),
        cost_estimate=cost,
    )(z_flat, KR, D_T)


def cp_regression_from_factors(z, A, B, C, D):
    """Convenience path when factors are not hoisted by the caller."""
    KR, D_T = build_cp_operands(A, B, C, D)
    return cp_regression(z, KR, D_T)


if __name__ == "__main__":
    # Small shapes consistent with the module's forward (CP branch):
    # z: (batch, r1, r2, r3); factors: (r1,R), (r2,R), (r3,R), (512,R).
    batch, r1, r2, r3 = 2, 4, 4, 4
    cp_rank = 8
    out_dim = 512  # fixed to 512 in the module

    key = jax.random.PRNGKey(0)
    kz, kA, kB, kC, kD, kz2 = jax.random.split(key, 6)

    # Deterministic parameter init mirroring init.data.uniform_(-0.1, 0.1).
    A = jax.random.uniform(kA, (r1, cp_rank), jnp.float32, -0.1, 0.1)
    B = jax.random.uniform(kB, (r2, cp_rank), jnp.float32, -0.1, 0.1)
    C = jax.random.uniform(kC, (r3, cp_rank), jnp.float32, -0.1, 0.1)
    D = jax.random.uniform(kD, (out_dim, cp_rank), jnp.float32, -0.1, 0.1)

    # NOTE: the registered buffers U_T*/U* (inv_bases/bases) are unused in
    # forward(), so they are intentionally not materialized here.
    # TODO(synk): tucker branch (cp_rank == 0) not implemented; CP branch only.

    # Factor preprocessing hoisted out of the per-call path.
    KR, D_T = build_cp_operands(A, B, C, D)

    # Pure-JAX f32 reference: cp_to_tensor + inner over the last 3 modes.
    W_full = jnp.einsum("ir,jr,kr,or->ijko", A, B, C, D)

    # --- check 1: tiny batch (single grid step in both axes) ---------------
    z = jax.random.normal(kz, (batch, r1, r2, r3), jnp.float32)
    out = jax.block_until_ready(cp_regression(z, KR, D_T))
    ref = jnp.einsum("bijk,ijko->bo", z, W_full)
    assert out.shape == (batch, out_dim)
    # bf16 input/weight streams (f32 accumulation) => loosened tolerance vs f32 ref.
    assert jnp.allclose(out, ref, rtol=5e-2, atol=5e-5), "mismatch (small batch)"

    # --- check 2: multi-step batch grid + partial final batch tile ---------
    batch2 = 50
    z2 = jax.random.normal(kz2, (batch2, r1, r2, r3), jnp.float32)
    out2 = jax.block_until_ready(cp_regression(z2, KR, D_T))
    ref2 = jnp.einsum("bijk,ijko->bo", z2, W_full)
    assert out2.shape == (batch2, out_dim)
    assert jnp.allclose(out2, ref2, rtol=5e-2, atol=5e-5), "mismatch (batched)"

    print("KERNEL_OK")
</pallas_src>

<mosaic_0001>
module attributes {stable_mosaic.version = 11 : i64} {
  func.func @cp_regression_kernel(%arg0: i32, %arg1: i32, %arg2: memref<2x64xbf16, #tpu.memory_space<vmem>>, %arg3: memref<64x8xbf16, #tpu.memory_space<vmem>>, %arg4: memref<8x512xbf16, #tpu.memory_space<vmem>>, %arg5: memref<2x512xf32, #tpu.memory_space<vmem>>, %arg6: memref<2x8xf32, #tpu.memory_space<vmem>>) attributes {dimension_semantics = [#tpu.dimension_semantics<parallel>, #tpu.dimension_semantics<arbitrary>], iteration_bounds = array<i64: 1, 1>, scalar_prefetch = 0 : i64, scratch_operands = 1 : i64, tpu.core_type = #tpu.core_type<tc>, window_params = [{transform_indices = @transform_0, window_bounds = array<i64: 2, 64>}, {transform_indices = @transform_1, window_bounds = array<i64: 64, 8>}, {pipeline_mode = #tpu.pipeline_mode<synchronous>, transform_indices = @transform_2, window_bounds = array<i64: 8, 512>}, {transform_indices = @transform_3, window_bounds = array<i64: 2, 512>}]} {
    %c0_i32 = arith.constant 0 : i32
    %0 = arith.cmpi eq, %arg1, %c0_i32 : i32
    %1 = arith.extui %0 : i1 to i32
    %c0_i32_0 = arith.constant 0 : i32
    %2 = arith.cmpi ne, %1, %c0_i32_0 : i32
    scf.if %2 {
      %cst_10 = arith.constant 0.000000e+00 : f32
      %12 = vector.broadcast %cst_10 : f32 to vector<2x8xf32>
      %c0_11 = arith.constant 0 : index
      %c0_12 = arith.constant 0 : index
      %13 = vector.load %arg6[%c0_11, %c0_12] : memref<2x8xf32, #tpu.memory_space<vmem>>, vector<2x8xf32>
      tpu.vector_store %arg6[%c0_11, %c0_12], %12 {strides = array<i32>} : memref<2x8xf32, #tpu.memory_space<vmem>>, vector<2x8xf32>,
    } else {
    }
    %c0 = arith.constant 0 : index
    %c0_1 = arith.constant 0 : index
    %3 = vector.load %arg6[%c0, %c0_1] : memref<2x8xf32, #tpu.memory_space<vmem>>, vector<2x8xf32>
    %c0_2 = arith.constant 0 : index
    %c0_3 = arith.constant 0 : index
    %4 = vector.load %arg2[%c0_2, %c0_3] : memref<2x64xbf16, #tpu.memory_space<vmem>>, vector<2x64xbf16>
    %c0_4 = arith.constant 0 : index
    %c0_5 = arith.constant 0 : index
    %5 = vector.load %arg3[%c0_4, %c0_5] : memref<64x8xbf16, #tpu.memory_space<vmem>>, vector<64x8xbf16>
    %cst = arith.constant dense<0.000000e+00> : vector<2x8xf32>
    %6 = tpu.matmul %4, %5, %cst {dimension_numbers = #tpu.dot_dimension_numbers<[1], [0], [0], [1], [0, 0, 1, 1], [], []>} : vector<2x64xbf16>, vector<64x8xbf16>, vector<2x8xf32> -> vector<2x8xf32>
    %7 = arith.addf %3, %6 : vector<2x8xf32>
    %c0_6 = arith.constant 0 : index
    %c0_7 = arith.constant 0 : index
    %8 = vector.load %arg6[%c0_6, %c0_7] : memref<2x8xf32, #tpu.memory_space<vmem>>, vector<2x8xf32>
    tpu.vector_store %arg6[%c0_6, %c0_7], %7 {strides = array<i32>} : memref<2x8xf32, #tpu.memory_space<vmem>>, vector<2x8xf32>,
    %c0_i32_8 = arith.constant 0 : i32
    %9 = arith.cmpi eq, %arg1, %c0_i32_8 : i32
    %10 = arith.extui %9 : i1 to i32
    %c0_i32_9 = arith.constant 0 : i32
    %11 = arith.cmpi ne, %10, %c0_i32_9 : i32
    scf.if %11 {
      %c0_10 = arith.constant 0 : index
      %c0_11 = arith.constant 0 : index
      %12 = vector.load %arg6[%c0_10, %c0_11] : memref<2x8xf32, #tpu.memory_space<vmem>>, vector<2x8xf32>
      %13 = arith.truncf %12 : vector<2x8xf32> to vector<2x8xbf16>
      %c0_12 = arith.constant 0 : index
      %c0_13 = arith.constant 0 : index
      %14 = vector.load %arg4[%c0_12, %c0_13] : memref<8x512xbf16, #tpu.memory_space<vmem>>, vector<8x512xbf16>
      %cst_14 = arith.constant dense<0.000000e+00> : vector<2x512xf32>
      %15 = tpu.matmul %13, %14, %cst_14 {dimension_numbers = #tpu.dot_dimension_numbers<[1], [0], [0], [1], [0, 0, 1, 1], [], []>} : vector<2x8xbf16>, vector<8x512xbf16>, vector<2x512xf32> -> vector<2x512xf32>
      %c0_15 = arith.constant 0 : index
      %c0_16 = arith.constant 0 : index
      %16 = vector.load %arg5[%c0_15, %c0_16] : memref<2x512xf32, #tpu.memory_space<vmem>>, vector<2x512xf32>
      tpu.vector_store %arg5[%c0_15, %c0_16], %15 {strides = array<i32>} : memref<2x512xf32, #tpu.memory_space<vmem>>, vector<2x512xf32>,
    } else {
    }
    return
  }
  func.func @transform_0(%arg0: i32, %arg1: i32) -> (i32, i32) {
    %c0_i32 = arith.constant 0 : i32
    return %arg0, %arg1 : i32, i32
  }
  func.func @transform_1(%arg0: i32, %arg1: i32) -> (i32, i32) {
    %c0_i32 = arith.constant 0 : i32
    %c0_i32_0 = arith.constant 0 : i32
    return %arg1, %c0_i32 : i32, i32
  }
  func.func @transform_2(%arg0: i32, %arg1: i32) -> (i32, i32) {
    %c0_i32 = arith.constant 0 : i32
    %c0_i32_0 = arith.constant 0 : i32
    %c0_i32_1 = arith.constant 0 : i32
    return %c0_i32, %c0_i32_0 : i32, i32
  }
  func.func @transform_3(%arg0: i32, %arg1: i32) -> (i32, i32) {
    %c0_i32 = arith.constant 0 : i32
    %c0_i32_0 = arith.constant 0 : i32
    return %arg0, %c0_i32 : i32, i32
  }
}

</mosaic_0001>

<bundles_post_ra>
// kernel: tpu_custom_call.1
= control target key start
LH: loop header
LB: loop body
LE: loop exit
PB: predicated region body
PF: predicated region fallthrough
CT: control target
= control target key end

     0   :  { %v323_v1 = vmov 0.0   ;;  %vm324_vm0 = vmmov 0   ;;  %vm20_vm1 = vcmask 58368   ;;  %s383_s0 = inlined_call_operand.vmem [shape: bf16[2,64], index: 0, kind: input, shape index: {}]   ;;  %s384_s1 = inlined_call_operand.vmem [shape: bf16[64,8], index: 1, kind: input, shape index: {}]   ;;  %s385_s2 = inlined_call_operand.vmem [shape: bf16[8,512], index: 2, kind: input, shape index: {}]   ;;  %s386_s3 = inlined_call_operand.hbm [shape: f32[2,512], index: 3, kind: output, shape index: {}]  }
   0x1   :  { %v291_v0 = vld [vmem:[%s384_s1] sm:$0xff]   ;;  %274 = vmatprep.subr.bf16.mxu0 %v323_v1  ;;  %v292_v2 = vld [vmem:[%s384_s1 + $0x8] sm:$0xff]   ;;  %282 = vmatprep.mubr.msk.bf16.mxu0 %vm324_vm0, %v323_v1  ;;  %21 = vst.msk [vmem:[#allocation2] sm:$0x3] %vm20_vm1, %v323_v1 }
   0x2   :  { %275 = vmatpush3.bf16.msra.mxu0 %v291_v0 }
   0x3   :  { %276 = vmatprep.subr.bf16.mxu0 %v323_v1 }
   0x4   :  { %8 = vsyncpa [#allocation4], 0  ;;  %v293_v3 = vld [vmem:[%s384_s1 + $0x10] sm:$0xff]   ;;  %v294_v4 = vld [vmem:[%s384_s1 + $0x18] sm:$0xff]   ;;  %vm56_vm2 = vcmask 523264   ;;  %vm124_vm3 = vcmask 1043456   ;;  %v228_v26 = vlaneseq }
   0x5   :  { %v23_v5 = vld [vmem:[%s383_s0] sm:$0x1]  ;;  %v109_v7 = vld [vmem:[%s385_s2 + $0x8] sm:$0xff]  ;;  %v325_v10 = vmov 0   ;;  %vm120_vm4 = vcmask 64512   ;;  %s327_s0 = smov [#allocation3]  }
   0x6   :  { %277 = vmatpush3.bf16.msra.mxu0 %v292_v2  ;;  %v108_v6 = vld [vmem:[%s385_s2] sm:$0xff]  ;;  %169 = vmatprep.mubr.bf16.mxu1 %v325_v10  ;;  %v264_v11 = vcombine.high %v109_v7, %v109_v7  ;;  %v263_v13 = vcombine.low %v109_v7, %v109_v7  ;;  %v326_v24 = vmov 1983009808   ;;  %v229_v32 = vshrl.u32 %v228_v26, 7  ;;  %s248_s1 = sshll.u32 %s327_s0, 4  ;;  %s249_s1 = int_to_ptr.vmem [resolvable:$true] %s248_s1 }
   0x7   :  { %278 = vmatprep.subr.bf16.mxu0 %v323_v1  ;;  %v262_v8 = vcombine.high %v108_v6, %v108_v6  ;;  %v261_v9 = vcombine.low %v108_v6, %v108_v6  ;;  %v226_v25 = vunpack.c.l.s4 %v326_v24  ;;  %s299_s2 = scalar_lea.vmem %s249_s1, 128  ;;  %p304_p1 = scmp.lt.s32.totalorder %s249_s1, %s249_s1 }
   0x8   :  { %v132_v14 = vsel %vm124_vm3, %v263_v13, 0  ;;  %v22_v15 = vld [vmem:[#allocation2] sm:$0x3]  ;;  %p300_p0 = scmp.ne.s32.totalorder %s249_s1, %s299_s2  ;;  %p305_p2 = scmp.lt.s32.totalorder %s299_s2, %s299_s2 }
   0x9   :  { %265 = vmatprep.subr.msk.bf16.mxu1 %vm124_vm3, %v262_v8  ;;  %v126_v12 = vsel %vm124_vm3, %v261_v9, 0  ;;  %v227_v31 = vunpack.c.0.s8 %v226_v25 }
   0xa   :  { %279 = vmatpush3.bf16.msra.mxu0 %v293_v3  ;;  %138 = vmatpush1.bf16.msra.mxu1 %v126_v12  ;;  %p306_p3 = por %p305_p2, %p304_p1 }
   0xb   :  { %280 = vmatprep.subr.bf16.mxu0 %v323_v1  ;;  %267 = vmatprep.subr.msk.bf16.mxu1 %vm124_vm3, %v264_v11  ;;  %v230_v33 = vsub.s32 %v227_v31, %v229_v32 }
   0xc   :  { %p307_p4 = pnand %p306_p3, %p300_p0 }
   0xe   :  { %281 = vmatpush3.bf16.msra.mxu0 %v294_v4 }
  0x11   :  { %283 = vmatmul.mubr.msk.bf16.vlgmr.msra.gmra.mrb[0].mxu0 %vm56_vm2, %v23_v5 }
  0xe4   :  { %v94_v16 = vpop.f32.mrb[0].mxu0 }
  0xe5   :  { %v100_v17 = vadd.f32 %v94_v16, %v22_v15  ;;  %v284_v18 = vpop.f32.mrb[1].mxu0 }
  0xe6   :  { %v97_v19 = vpop.f32.mrb[2].mxu0 }
  0xe7   :  { %102 = vst.msk [vmem:[#allocation2] sm:$0x3] %vm20_vm1, %v100_v17  ;;  %v285_v20 = vpop.f32.mrb[3].mxu0 }
  0xee   :  { %v106_v21 = vld [vmem:[#allocation2] sm:$0x3] }
  0xef   :  { %v107_v22 = vpack.c.bf16 %v106_v21, %v106_v21 }
  0xf1   :  { %266 = vmatmul.mubr.msk.bf16.vlgmr.msra.gmra.mrb[0].mxu1 %vm120_vm4, %v107_v22 }
  0xf2   :  { %179 = vmatpush1.bf16.msra.mxu1 %v132_v14  ;;  %210 = vmatprep.mubr.bf16.mxu1 %v325_v10 }
  0xf9   :  { %268 = vmatmul.mubr.msk.bf16.vlgmr.msra.gmra.mrb[4].mxu1 %vm120_vm4, %v107_v22 }
 0x1c4   :  { %v171_v23 = vpop.f32.mrb[0].mxu1 }
 0x1c5   :  { %v173_v27 = vpop.f32.mrb[1].mxu1 }
 0x1c6   :  { %v223_v28 = vcombine.low %v171_v23, %v173_v27  ;;  %v175_v29 = vpop.f32.mrb[2].mxu1 }
 0x1c7   :  { %v176_v30 = vpop.f32.mrb[3].mxu1 }
 0x1c8   :  { %v231_v39 = vrot.slane %v223_v28, %v230_v33 }
 0x1cc   :  { %v212_v34 = vpop.f32.mrb[4].mxu1 }
 0x1cd   :  { %v214_v35 = vpop.f32.mrb[5].mxu1 }
 0x1ce   :  { %v224_v36 = vcombine.low %v212_v34, %v214_v35  ;;  %v216_v37 = vpop.f32.mrb[6].mxu1 }
 0x1cf   :  { %v217_v38 = vpop.f32.mrb[7].mxu1 }
 0x1d0   :  { %v238_v40 = vrot.slane %v224_v36, %v230_v33 }
 0x1d2   :  { %v239_v41 = vcombine.low %v231_v39, %v238_v40 }
 0x1d4   :  { %241 = vst [vmem:[#allocation3] sm:$0xff] %v239_v41 }
 0x1d5   :  { %310 = shalt.err (!%p307_p4)
}
 0x1d6   :  { %s311_s28 = scalar_lea.hbm %s386_s3, 128 }
 0x1d7   :  { %p312_p5 = scmp.ne.s32.totalorder %s386_s3, %s311_s28  ;;  %p315_p6 = scmp.lt.u32.totalorder %s311_s28, %s386_s3 }
 0x1d9   :  { %p317_p7 = pnand %p315_p6, %p312_p5 }
 0x1db   :  { %320 = shalt.err (!%p317_p7)
}
 0x1dc   :  { %251 = dma.vmem_to_hbm [thread:$0]  %s249_s1, 128, %s386_s3, [#allocation4]  }
 0x1dd   :  { %321 = dma.done.wait [#allocation4], 128  }
 0x1de   :  { %322 = vsyncadd [#allocation4], 4294967168 }
 0x1df   :  { %255 = vsyncpa [#allocation4], 1 }

</bundles_post_ra>
